<compile_context>
chip_gen: v7x
topology: tpu7x:2x2x1
jax: 0.10.0
libtpu: 0.0.40
codegen_flags: <defaults>
</compile_context>

<pallas_src>
import jax
import jax.numpy as jnp
from jax import lax
from jax.experimental import pallas as pl
from jax.experimental.pallas import tpu as pltpu

LANES = 128


def _round_up(x, n):
    return ((x + n - 1) // n) * n


def _sublane_packing(dtype) -> int:
    # f32 -> 8, bf16/f16 -> 16, int8/fp8 -> 32 rows per packed sublane tile.
    itemsize = jnp.dtype(dtype).itemsize
    return 8 * max(1, 4 // itemsize)


def _default_tile_m_max() -> int:
    """Pick block rows by TPU generation (bigger steps amortize ~0.35us/step)."""
    try:
        kind = jax.devices()[0].device_kind.lower()
    except Exception:
        kind = ""
    if "7" in kind:          # v7x: ~3.2 TB/s HBM -> 8 MiB f32 tiles
        return 16384
    if "v6" in kind or "6e" in kind:   # v6e: ~1.4 TB/s -> 4 MiB f32 tiles
        return 8192
    return 4096              # v5e / unknown: overhead already <15% at 2 MiB


def _make_partial_kernel(tile_m: int, m_valid: int, num_blocks: int):
    """Per-block (8,128) partial sums of squared error, masking ragged rows."""
    ragged = (m_valid % tile_m) != 0

    def fold8(x):
        tm, lanes = x.shape
        # Groups of 8 rows are whole f32 vregs -> pure VALU adds, no XLU.
        return jnp.sum(x.reshape(tm // 8, 8, lanes), axis=0)

    def kernel(f_ref, t_ref, partial_ref):
        f = f_ref[...].astype(jnp.float32)   # cast in-register (free VPU op)
        t = t_ref[...].astype(jnp.float32)
        d = f - t
        sq = d * d

        if not ragged:
            partial_ref[...] = fold8(sq)
        else:
            i = pl.program_id(0)
            is_last = i == (num_blocks - 1)

            @pl.when(is_last)
            def _():
                # Rows past m_valid were DMA'd out of bounds (garbage) -> mask.
                row = lax.broadcasted_iota(jnp.int32, sq.shape, 0) + i * tile_m
                partial_ref[...] = fold8(jnp.where(row < m_valid, sq, 0.0))

            @pl.when(jnp.logical_not(is_last))
            def _():
                partial_ref[...] = fold8(sq)

    return kernel


def _content_loss_impl(features, target, *, tile_m_max=None):
    assert features.shape == target.shape, "features/target shape mismatch"
    total_n = features.size
    if tile_m_max is None:
        tile_m_max = _default_tile_m_max()
    sub = max(_sublane_packing(features.dtype), _sublane_packing(target.dtype))

    # ---- lane-dense [m, 128] view (free bitcast when total_n % 128 == 0) ----
    f_flat = features.reshape(-1)
    t_flat = target.reshape(-1)
    rem = total_n % LANES
    if rem:
        # Rare for NST activations (C*H*W usually a multiple of 128).  Only the
        # sub-128 tail is padded; both operands padded with zeros so the pad
        # region contributes nothing to the loss.
        # TODO(synk): a zero-copy path for non-lane-aligned totals would need a
        # manual-DMA (memory_space=pl.ANY) kernel.
        pad = LANES - rem
        f_flat = jnp.pad(f_flat, (0, pad))
        t_flat = jnp.pad(t_flat, (0, pad))
    m = f_flat.size // LANES
    f2d = f_flat.reshape(m, LANES)
    t2d = t_flat.reshape(m, LANES)

    # ---- tile sizing ---------------------------------------------------------
    # >=2 blocks for medium/large inputs so the "parallel" grid axis can shard
    # across both TensorCores on v7x (harmless single extra step elsewhere).
    min_blocks = 2 if m > 1024 else 1
    num_blocks = max(min_blocks, int(pl.cdiv(m, tile_m_max)))
    tile_m = max(sub, _round_up(int(pl.cdiv(m, num_blocks)), sub))
    num_blocks = int(pl.cdiv(m, tile_m))

    in_bytes = f2d.dtype.itemsize + t2d.dtype.itemsize
    footprint = 2 * tile_m * LANES * in_bytes          # 2 buffers x both inputs
    vmem_limit = min(48 * 1024 * 1024,
                     max(32 * 1024 * 1024, footprint + 8 * 1024 * 1024))

    cost = pl.CostEstimate(
        flops=3 * m * LANES,
        transcendentals=0,
        bytes_accessed=m * LANES * in_bytes + num_blocks * 8 * LANES * 4,
    )

    kernel = _make_partial_kernel(tile_m, m, num_blocks)

    partials = pl.pallas_call(
        kernel,
        out_shape=jax.ShapeDtypeStruct((num_blocks * 8, LANES), jnp.float32),
        grid_spec=pltpu.PrefetchScalarGridSpec(
            num_scalar_prefetch=0,
            grid=(num_blocks,),
            in_specs=[
                pl.BlockSpec((tile_m, LANES), lambda i: (i, 0)),
                pl.BlockSpec((tile_m, LANES), lambda i: (i, 0)),
            ],
            out_specs=pl.BlockSpec((8, LANES), lambda i: (i, 0)),
        ),
        compiler_params=pltpu.CompilerParams(
            dimension_semantics=("parallel",),
            vmem_limit_bytes=vmem_limit,
        ),
        cost_estimate=cost,
    )(f2d, t2d)

    # Tiny final reduction in plain JAX (two-level f32 sum), mean over TRUE N.
    loss = jnp.sum(partials) * (1.0 / jnp.float32(total_n))

    # Identity pass-through: return the original array (zero extra HBM traffic).
    return features, loss


# ---- custom VJP so the loss is differentiable w.r.t. features ----------------
@jax.custom_vjp
def content_loss_forward(features, target):
    """Gatys ContentLoss: returns (features, mean((features - target)**2))."""
    return _content_loss_impl(features, target)


def _content_loss_fwd(features, target):
    out = _content_loss_impl(features, target)
    return out, (features, target)


def _content_loss_bwd(res, cotangents):
    features, target = res
    g_feat, g_loss = cotangents
    n = jnp.float32(features.size)
    diff = features.astype(jnp.float32) - target.astype(jnp.float32)
    d_feat = g_feat.astype(jnp.float32) + (2.0 * g_loss / n) * diff
    # target is detached in the reference module -> no gradient flows to it.
    return d_feat.astype(features.dtype), jnp.zeros_like(target)


content_loss_forward.defvjp(_content_loss_fwd, _content_loss_bwd)


if __name__ == "__main__":
    # Small NCHW activation shapes: batch=2, channels=4, spatial=16x16
    B, C, H, W = 2, 4, 16, 16
    key = jax.random.PRNGKey(0)
    k_feat, k_tgt = jax.random.split(key)

    features = jax.random.normal(k_feat, (B, C, H, W), dtype=jnp.float32)
    target = jax.random.normal(k_tgt, (B, C, H, W), dtype=jnp.float32)

    feat_out, loss = content_loss_forward(features, target)
    jax.block_until_ready((feat_out, loss))

    # correctness vs plain-JAX reference
    ref_loss = jnp.mean((features - target) ** 2)
    assert jnp.allclose(feat_out, features), "pass-through mismatch"
    assert jnp.allclose(loss, ref_loss, rtol=1e-6, atol=1e-6), (loss, ref_loss)

    # gradient check (ContentLoss exists to optimize the input image in NST)
    g = jax.grad(lambda f: content_loss_forward(f, target)[1])(features)
    g_ref = 2.0 * (features - target) / features.size
    assert jnp.allclose(g, g_ref, rtol=1e-5, atol=1e-6), "vjp mismatch"

    # ragged-row path: rows = 105 (lane-aligned total, not a multiple of 8)
    odd_f = jax.random.normal(k_feat, (3, 5, 7, 128), dtype=jnp.float32)
    odd_t = jax.random.normal(k_tgt, (3, 5, 7, 128), dtype=jnp.float32)
    _, odd_loss = content_loss_forward(odd_f, odd_t)
    jax.block_until_ready(odd_loss)
    assert jnp.allclose(odd_loss, jnp.mean((odd_f - odd_t) ** 2),
                        rtol=1e-6, atol=1e-6), "ragged-block mask mismatch"

    print("KERNEL_OK")
</pallas_src>

<mosaic_0001>
module attributes {stable_mosaic.version = 11 : i64} {
  func.func @kernel(%arg0: i32, %arg1: memref<16x128xf32, #tpu.memory_space<vmem>>, %arg2: memref<16x128xf32, #tpu.memory_space<vmem>>, %arg3: memref<8x128xf32, #tpu.memory_space<vmem>>) attributes {dimension_semantics = [#tpu.dimension_semantics<parallel>], iteration_bounds = array<i64: 1>, scalar_prefetch = 0 : i64, scratch_operands = 0 : i64, tpu.core_type = #tpu.core_type<tc>, window_params = [{transform_indices = @transform_0, window_bounds = array<i64: 16, 128>}, {transform_indices = @transform_1, window_bounds = array<i64: 16, 128>}, {transform_indices = @transform_2, window_bounds = array<i64: 8, 128>}]} {
    %c0 = arith.constant 0 : index
    %c0_0 = arith.constant 0 : index
    %0 = vector.load %arg1[%c0, %c0_0] : memref<16x128xf32, #tpu.memory_space<vmem>>, vector<16x128xf32>
    %c0_1 = arith.constant 0 : index
    %c0_2 = arith.constant 0 : index
    %1 = vector.load %arg2[%c0_1, %c0_2] : memref<16x128xf32, #tpu.memory_space<vmem>>, vector<16x128xf32>
    %2 = arith.subf %0, %1 : vector<16x128xf32>
    %3 = arith.mulf %2, %2 : vector<16x128xf32>
    %4 = vector.shape_cast %3 : vector<16x128xf32> to vector<2x8x128xf32>
    %cst = arith.constant dense<0.000000e+00> : vector<8x128xf32>
    %5 = vector.multi_reduction <add>, %4, %cst [0] : vector<2x8x128xf32> to vector<8x128xf32>
    %c0_3 = arith.constant 0 : index
    %c0_4 = arith.constant 0 : index
    %6 = vector.load %arg3[%c0_3, %c0_4] : memref<8x128xf32, #tpu.memory_space<vmem>>, vector<8x128xf32>
    tpu.vector_store %arg3[%c0_3, %c0_4], %5 {strides = array<i32>} : memref<8x128xf32, #tpu.memory_space<vmem>>, vector<8x128xf32>,
    return
  }
  func.func @transform_0(%arg0: i32) -> (i32, i32) {
    %c0_i32 = arith.constant 0 : i32
    %c0_i32_0 = arith.constant 0 : i32
    return %arg0, %c0_i32 : i32, i32
  }
  func.func @transform_1(%arg0: i32) -> (i32, i32) {
    %c0_i32 = arith.constant 0 : i32
    %c0_i32_0 = arith.constant 0 : i32
    return %arg0, %c0_i32 : i32, i32
  }
  func.func @transform_2(%arg0: i32) -> (i32, i32) {
    %c0_i32 = arith.constant 0 : i32
    %c0_i32_0 = arith.constant 0 : i32
    return %arg0, %c0_i32 : i32, i32
  }
}

</mosaic_0001>

<bundles_post_ra>
// kernel: tpu_custom_call.1
= control target key start
LH: loop header
LB: loop body
LE: loop exit
PB: predicated region body
PF: predicated region fallthrough
CT: control target
= control target key end

     0   :  { %7 = vsyncpa [#allocation3], 0  ;;  %s199_s0 = inlined_call_operand.hbm [shape: f32[16,128], index: 0, kind: input, shape index: {}]   ;;  %s200_s1 = inlined_call_operand.hbm [shape: f32[16,128], index: 1, kind: input, shape index: {}]   ;;  %s201_s2 = inlined_call_operand.hbm [shape: f32[8,128], index: 2, kind: output, shape index: {}]  }
   0x1   :  { %8 = vsyncpa [#allocation6], 0 }
   0x2   :  { %9 = vsyncpa [#allocation4], 0  ;;  %s143_s9 = smov [#allocation2]   ;;  %s71_s13 = scalar_lea.hbm %s199_s0, 256 }
   0x3   :  { %s15_s10 = sshll.u32 %s143_s9, 4  ;;  %p72_p0 = scmp.ne.s32.totalorder %s199_s0, %s71_s13  ;;  %s16_s10 = int_to_ptr.vmem [resolvable:$true] %s15_s10 }
   0x4   :  { %p75_p1 = scmp.lt.u32.totalorder %s71_s13, %s199_s0 }
   0x6   :  { %p77_p2 = pnand %p75_p1, %p72_p0 }
   0x8   :  { %80 = shalt.err (!%p77_p2)
}
   0x9   :  { %s81_s18 = scalar_lea.vmem %s16_s10, 256  ;;  %p86_p4 = scmp.lt.s32.totalorder %s16_s10, %s16_s10 }
   0xa   :  { %p82_p3 = scmp.ne.s32.totalorder %s16_s10, %s81_s18  ;;  %p87_p5 = scmp.lt.s32.totalorder %s81_s18, %s81_s18 }
   0xc   :  { %p88_p6 = por %p87_p5, %p86_p4 }
   0xe   :  { %p89_p7 = pnand %p88_p6, %p82_p3 }
  0x10   :  { %92 = shalt.err (!%p89_p7)
}
  0x11   :  { %s144_s19 = smov 128   ;;  %s145_s20 = smov 8  }
  0x12   :  { %21 = dma.hbm_to_vmem [thread:$0]  %s199_s0, 256, %s16_s10, [#allocation3], %s144_s19, %s144_s19, %s145_s20  }
  0x13   :  { %s146_s23 = smov [#allocation5]   ;;  %s93_s27 = scalar_lea.hbm %s200_s1, 256 }
  0x14   :  { %s27_s24 = sshll.u32 %s146_s23, 4  ;;  %p94_p8 = scmp.ne.s32.totalorder %s200_s1, %s93_s27  ;;  %s28_s24 = int_to_ptr.vmem [resolvable:$true] %s27_s24 }
  0x15   :  { %p97_p9 = scmp.lt.u32.totalorder %s93_s27, %s200_s1 }
  0x17   :  { %p99_p10 = pnand %p97_p9, %p94_p8 }
  0x19   :  { %102 = shalt.err (!%p99_p10)
}
  0x1a   :  { %s103_s4 = scalar_lea.vmem %s28_s24, 256  ;;  %p108_p12 = scmp.lt.s32.totalorder %s28_s24, %s28_s24 }
  0x1b   :  { %p104_p11 = scmp.ne.s32.totalorder %s28_s24, %s103_s4  ;;  %p109_p13 = scmp.lt.s32.totalorder %s103_s4, %s103_s4 }
  0x1d   :  { %p110_p0 = por %p109_p13, %p108_p12 }
  0x1f   :  { %p111_p1 = pnand %p110_p0, %p104_p11 }
  0x21   :  { %114 = shalt.err (!%p111_p1)
}
  0x22   :  { %33 = dma.hbm_to_vmem [thread:$0]  %s200_s1, 256, %s28_s24, [#allocation6], %s144_s19, %s144_s19, %s145_s20  }
  0x23   :  { %137 = dma.done.wait [#allocation3], 256  }
  0x24   :  { %138 = vsyncadd [#allocation3], 4294967040 }
  0x25   :  { %139 = dma.done.wait [#allocation6], 256  }
  0x26   :  { %140 = vsyncadd [#allocation6], 4294967040  ;;  %v40_v0 = vld [vmem:[#allocation2] sm:$0xff]  ;;  %v41_v1 = vld [vmem:[#allocation2 + $0x8] sm:$0xff]  ;;  %s147_s6 = smov [#allocation7]  }
  0x27   :  { %v42_v2 = vld [vmem:[#allocation5] sm:$0xff]  ;;  %v43_v3 = vld [vmem:[#allocation5 + $0x8] sm:$0xff]  ;;  %s56_s7 = sshll.u32 %s147_s6, 4  ;;  %s57_s7 = int_to_ptr.vmem [resolvable:$true] %s56_s7 }
  0x28   :  { %v44_v4 = vsub.f32 %v40_v0, %v42_v2  ;;  %v45_v5 = vsub.f32 %v41_v1, %v43_v3  ;;  %s115_s8 = scalar_lea.vmem %s57_s7, 128  ;;  %p120_p3 = scmp.lt.s32.totalorder %s57_s7, %s57_s7 }
  0x29   :  { %p116_p2 = scmp.ne.s32.totalorder %s57_s7, %s115_s8  ;;  %p121_p4 = scmp.lt.s32.totalorder %s115_s8, %s115_s8 }
  0x2a   :  { %v46_v6 = vmul.f32 %v44_v4, %v44_v4  ;;  %v47_v7 = vmul.f32 %v45_v5, %v45_v5 }
  0x2b   :  { %p122_p5 = por %p121_p4, %p120_p3 }
  0x2c   :  { %v48_v8 = vadd.f32 %v47_v7, %v46_v6 }
  0x2d   :  { %p123_p6 = pnand %p122_p5, %p116_p2 }
  0x2e   :  { %49 = vst [vmem:[#allocation7] sm:$0xff] %v48_v8 }
  0x2f   :  { %126 = shalt.err (!%p123_p6)
}
  0x30   :  { %s127_s10 = scalar_lea.hbm %s201_s2, 128 }
  0x31   :  { %p128_p7 = scmp.ne.s32.totalorder %s201_s2, %s127_s10  ;;  %p131_p8 = scmp.lt.u32.totalorder %s127_s10, %s201_s2 }
  0x33   :  { %p133_p9 = pnand %p131_p8, %p128_p7 }
  0x35   :  { %136 = shalt.err (!%p133_p9)
}
  0x36   :  { %59 = dma.vmem_to_hbm [thread:$0]  %s57_s7, 128, %s201_s2, [#allocation4]  }
  0x37   :  { %141 = dma.done.wait [#allocation4], 128  }
  0x38   :  { %142 = vsyncadd [#allocation4], 4294967168 }
  0x39   :  { %63 = vsyncpa [#allocation3], 1 }
  0x3a   :  { %64 = vsyncpa [#allocation6], 1 }
  0x3b   :  { %65 = vsyncpa [#allocation4], 1 }

</bundles_post_ra>
